<compile_context>
chip_gen: v5e
topology: v5e:2x2
jax: 0.10.0
libtpu: 0.0.40
codegen_flags: <defaults>
</compile_context>

<pallas_src>
import jax
import jax.numpy as jnp
from jax.experimental import pallas as pl
from jax.experimental.pallas import tpu as pltpu


def _round_up(x, m):
    return ((x + m - 1) // m) * m


def critic_kernel(x_ref, w1_ref, b1_ref, w2_ref, b2_ref, w3_ref, b3_ref, o_ref):
    """One batch tile of the fused 3-layer MLP.

    x_ref : (TB, Cp)       activations (f32 or bf16)
    w1_ref: (Cp, Hp)       layer-1 weight, (in, out) layout
    b1_ref: (1, Hp)        layer-1 bias (f32)
    w2_ref: (Hp, Hp)       layer-2 weight
    b2_ref: (1, Hp)        layer-2 bias (f32)
    w3_ref: (1, Hp)        layer-3 weight as a lane-dense row
    b3_ref: (1,) in SMEM   layer-3 bias (scalar, f32)
    o_ref : (TB, 1)        value output (f32)
    """
    x = x_ref[...]

    # Layer 1: MXU matmul with f32 accumulation; bias + ReLU on the VPU.
    h1 = jnp.dot(x, w1_ref[...], preferred_element_type=jnp.float32)
    h1 = jnp.maximum(h1 + b1_ref[...], 0.0)

    # Layer 2.
    h2 = jnp.dot(h1.astype(w2_ref.dtype), w2_ref[...],
                 preferred_element_type=jnp.float32)
    h2 = jnp.maximum(h2 + b2_ref[...], 0.0)

    # Layer 3 (H -> 1): multiply by the (1, Hp) weight row and reduce across
    # lanes (VPU/XLU) instead of issuing an N=1 MXU matmul.
    w3_row = w3_ref[...].astype(jnp.float32)
    v = jnp.sum(h2 * w3_row, axis=-1, keepdims=True) + b3_ref[0]
    o_ref[...] = v.astype(o_ref.dtype)


def centralized_critic_forward(x, params, *, tile_b=256,
                               compute_dtype=jnp.float32):
    """x: (B, num_agents*state_dim) -> (B, 1) float32 critic values."""
    w1, b1, w2, b2, w3, b3 = params
    B, C = x.shape
    H = w1.shape[1]

    # Pad feature / hidden dims to full-lane multiples of 128 (zeros are exact:
    # padded columns produce ReLU(0)=0 and contribute 0 to every dot product).
    Cp = _round_up(C, 128)
    Hp = _round_up(H, 128)

    # Large batch tile, clamped so tiny batches are not over-padded; batch is
    # zero-padded up to a multiple of the tile and sliced back at the end.
    tile_b = max(8, _round_up(min(int(tile_b), _round_up(B, 8)), 8))
    B_pad = _round_up(B, tile_b)

    f32 = jnp.float32
    x_p = jnp.zeros((B_pad, Cp), f32).at[:B, :C].set(x.astype(f32))
    w1_p = jnp.zeros((Cp, Hp), f32).at[:C, :H].set(w1.astype(f32))
    b1_p = jnp.zeros((1, Hp), f32).at[0, :H].set(b1.astype(f32).reshape(-1))
    w2_p = jnp.zeros((Hp, Hp), f32).at[:H, :H].set(w2.astype(f32))
    b2_p = jnp.zeros((1, Hp), f32).at[0, :H].set(b2.astype(f32).reshape(-1))
    w3_p = jnp.zeros((1, Hp), f32).at[0, :H].set(w3.astype(f32).reshape(-1))
    b3_p = jnp.asarray(b3, f32).reshape((1,))

    if compute_dtype != jnp.float32:
        # bf16 activations/weights on the MXU fast path; accumulation stays
        # f32 inside the kernel; biases and the output stay f32.
        x_p = x_p.astype(compute_dtype)
        w1_p = w1_p.astype(compute_dtype)
        w2_p = w2_p.astype(compute_dtype)
        w3_p = w3_p.astype(compute_dtype)

    grid = (B_pad // tile_b,)
    const = lambda i: (0, 0)

    out = pl.pallas_call(
        critic_kernel,
        out_shape=jax.ShapeDtypeStruct((B_pad, 1), jnp.float32),
        grid_spec=pltpu.PrefetchScalarGridSpec(
            num_scalar_prefetch=0,
            grid=grid,
            in_specs=[
                pl.BlockSpec((tile_b, Cp), lambda i: (i, 0)),       # x tile
                pl.BlockSpec((Cp, Hp), const),                      # W1 (resident)
                pl.BlockSpec((1, Hp), const),                       # b1
                pl.BlockSpec((Hp, Hp), const),                      # W2 (resident)
                pl.BlockSpec((1, Hp), const),                       # b2
                pl.BlockSpec((1, Hp), const),                       # w3 row
                pl.BlockSpec(memory_space=pltpu.MemorySpace.SMEM),  # b3 scalar
            ],
            out_specs=pl.BlockSpec((tile_b, 1), lambda i: (i, 0)),
        ),
        compiler_params=pltpu.CompilerParams(
            # Batch axis is independent -> shard across TensorCores (v7x/megacore).
            dimension_semantics=("parallel",),
            # NOTE: if hidden_dim is scaled up (>= 2048), use bf16 weights,
            # consider pipeline_mode=pl.Buffered(1) on the constant-index weight
            # specs, and raise vmem_limit_bytes here to fit VMEM residency.
        ),
    )(x_p, w1_p, b1_p, w2_p, b2_p, w3_p, b3_p)

    return out[:B]


def init_params(key, centralized_state_dim, hidden_dim):
    """Deterministic PyTorch nn.Linear-style init: U(-1/sqrt(fan_in), +)."""
    ks = jax.random.split(key, 6)

    def lin(kw, kb, fan_in, fan_out):
        bound = 1.0 / jnp.sqrt(jnp.float32(fan_in))
        w = jax.random.uniform(kw, (fan_in, fan_out), jnp.float32, -bound, bound)
        b = jax.random.uniform(kb, (fan_out,), jnp.float32, -bound, bound)
        return w, b

    w1, b1 = lin(ks[0], ks[1], centralized_state_dim, hidden_dim)
    w2, b2 = lin(ks[2], ks[3], hidden_dim, hidden_dim)
    w3, b3 = lin(ks[4], ks[5], hidden_dim, 1)
    return (w1, b1, w2, b2, w3.reshape(-1), b3)   # w3 as (H,), b3 as (1,)


if __name__ == "__main__":
    # Small shapes consistent with the module: num_agents=4, state_dim=8,
    # hidden_dim=32, batch=16 -> centralized state dim = 32.
    num_agents, state_dim, hidden_dim, batch = 4, 8, 32, 16
    centralized_state_dim = num_agents * state_dim

    key = jax.random.PRNGKey(0)
    k_params, k_x = jax.random.split(key)
    params = init_params(k_params, centralized_state_dim, hidden_dim)
    x = jax.random.normal(k_x, (batch, centralized_state_dim), jnp.float32)

    # f32 path: exact module semantics.
    out = jax.block_until_ready(centralized_critic_forward(x, params))

    # Plain-JAX reference of the same MLP.
    w1, b1, w2, b2, w3, b3 = params
    ref = jnp.maximum(x @ w1 + b1[None, :], 0.0)
    ref = jnp.maximum(ref @ w2 + b2[None, :], 0.0)
    ref = ref @ w3.reshape(hidden_dim, 1) + b3[None, :]
    assert out.shape == (batch, 1)
    assert jnp.allclose(out, ref, atol=1e-5, rtol=1e-5), \
        float(jnp.max(jnp.abs(out - ref)))

    # bf16 compute path (MXU fast path, f32 accumulation) — looser tolerance.
    out_bf16 = jax.block_until_ready(
        centralized_critic_forward(x, params, compute_dtype=jnp.bfloat16))
    assert out_bf16.shape == (batch, 1)
    assert jnp.allclose(out_bf16, ref, atol=5e-2, rtol=5e-2), \
        float(jnp.max(jnp.abs(out_bf16 - ref)))

    print("KERNEL_OK")
</pallas_src>

<mosaic_0001>
module attributes {stable_mosaic.version = 11 : i64} {
  func.func @critic_kernel(%arg0: i32, %arg1: memref<16x128xf32, #tpu.memory_space<vmem>>, %arg2: memref<128x128xf32, #tpu.memory_space<vmem>>, %arg3: memref<1x128xf32, #tpu.memory_space<vmem>>, %arg4: memref<128x128xf32, #tpu.memory_space<vmem>>, %arg5: memref<1x128xf32, #tpu.memory_space<vmem>>, %arg6: memref<1x128xf32, #tpu.memory_space<vmem>>, %arg7: memref<1xf32, #tpu.memory_space<smem>>, %arg8: memref<16x1xf32, #tpu.memory_space<vmem>>) attributes {dimension_semantics = [#tpu.dimension_semantics<parallel>], iteration_bounds = array<i64: 1>, scalar_prefetch = 0 : i64, scratch_operands = 0 : i64, tpu.core_type = #tpu.core_type<tc>, window_params = [{transform_indices = @transform_0, window_bounds = array<i64: 16, 128>}, {pipeline_mode = #tpu.pipeline_mode<synchronous>, transform_indices = @transform_1, window_bounds = array<i64: 128, 128>}, {pipeline_mode = #tpu.pipeline_mode<synchronous>, transform_indices = @transform_2, window_bounds = array<i64: 1, 128>}, {pipeline_mode = #tpu.pipeline_mode<synchronous>, transform_indices = @transform_3, window_bounds = array<i64: 128, 128>}, {pipeline_mode = #tpu.pipeline_mode<synchronous>, transform_indices = @transform_4, window_bounds = array<i64: 1, 128>}, {pipeline_mode = #tpu.pipeline_mode<synchronous>, transform_indices = @transform_5, window_bounds = array<i64: 1, 128>}, {transform_indices = @transform_6, window_bounds = array<i64: 1>}, {transform_indices = @transform_7, window_bounds = array<i64: 16, 1>}]} {
    %c0 = arith.constant 0 : index
    %c0_0 = arith.constant 0 : index
    %0 = vector.load %arg1[%c0, %c0_0] : memref<16x128xf32, #tpu.memory_space<vmem>>, vector<16x128xf32>
    %c0_1 = arith.constant 0 : index
    %c0_2 = arith.constant 0 : index
    %1 = vector.load %arg2[%c0_1, %c0_2] : memref<128x128xf32, #tpu.memory_space<vmem>>, vector<128x128xf32>
    %cst = arith.constant dense<0.000000e+00> : vector<16x128xf32>
    %2 = tpu.matmul %0, %1, %cst {dimension_numbers = #tpu.dot_dimension_numbers<[1], [0], [0], [1], [0, 0, 1, 1], [], []>} : vector<16x128xf32>, vector<128x128xf32>, vector<16x128xf32> -> vector<16x128xf32>
    %c0_3 = arith.constant 0 : index
    %c0_4 = arith.constant 0 : index
    %3 = vector.load %arg3[%c0_3, %c0_4] : memref<1x128xf32, #tpu.memory_space<vmem>>, vector<1x128xf32>
    %4 = vector.broadcast %3 : vector<1x128xf32> to vector<16x128xf32>
    %5 = arith.addf %2, %4 : vector<16x128xf32>
    %cst_5 = arith.constant 0.000000e+00 : f32
    %6 = vector.broadcast %cst_5 : f32 to vector<16x128xf32>
    %7 = arith.maximumf %5, %6 : vector<16x128xf32>
    %c0_6 = arith.constant 0 : index
    %c0_7 = arith.constant 0 : index
    %8 = vector.load %arg4[%c0_6, %c0_7] : memref<128x128xf32, #tpu.memory_space<vmem>>, vector<128x128xf32>
    %cst_8 = arith.constant dense<0.000000e+00> : vector<16x128xf32>
    %9 = tpu.matmul %7, %8, %cst_8 {dimension_numbers = #tpu.dot_dimension_numbers<[1], [0], [0], [1], [0, 0, 1, 1], [], []>} : vector<16x128xf32>, vector<128x128xf32>, vector<16x128xf32> -> vector<16x128xf32>
    %c0_9 = arith.constant 0 : index
    %c0_10 = arith.constant 0 : index
    %10 = vector.load %arg5[%c0_9, %c0_10] : memref<1x128xf32, #tpu.memory_space<vmem>>, vector<1x128xf32>
    %11 = vector.broadcast %10 : vector<1x128xf32> to vector<16x128xf32>
    %12 = arith.addf %9, %11 : vector<16x128xf32>
    %cst_11 = arith.constant 0.000000e+00 : f32
    %13 = vector.broadcast %cst_11 : f32 to vector<16x128xf32>
    %14 = arith.maximumf %12, %13 : vector<16x128xf32>
    %c0_12 = arith.constant 0 : index
    %c0_13 = arith.constant 0 : index
    %15 = vector.load %arg6[%c0_12, %c0_13] : memref<1x128xf32, #tpu.memory_space<vmem>>, vector<1x128xf32>
    %16 = vector.broadcast %15 : vector<1x128xf32> to vector<16x128xf32>
    %17 = arith.mulf %14, %16 : vector<16x128xf32>
    %cst_14 = arith.constant dense<0.000000e+00> : vector<16xf32>
    %18 = vector.multi_reduction <add>, %17, %cst_14 [1] : vector<16x128xf32> to vector<16xf32>
    %19 = vector.shape_cast %18 : vector<16xf32> to vector<16x1xf32>
    %c0_15 = arith.constant 0 : index
    %20 = memref.load %arg7[%c0_15] : memref<1xf32, #tpu.memory_space<smem>>
    %21 = vector.broadcast %20 : f32 to vector<16x1xf32>
    %22 = arith.addf %19, %21 : vector<16x1xf32>
    %c0_16 = arith.constant 0 : index
    %c0_17 = arith.constant 0 : index
    %23 = vector.load %arg8[%c0_16, %c0_17] : memref<16x1xf32, #tpu.memory_space<vmem>>, vector<16x1xf32>
    tpu.vector_store %arg8[%c0_16, %c0_17], %22 {strides = array<i32>} : memref<16x1xf32, #tpu.memory_space<vmem>>, vector<16x1xf32>,
    return
  }
  func.func @transform_0(%arg0: i32) -> (i32, i32) {
    %c0_i32 = arith.constant 0 : i32
    %c0_i32_0 = arith.constant 0 : i32
    return %arg0, %c0_i32 : i32, i32
  }
  func.func @transform_1(%arg0: i32) -> (i32, i32) {
    %c0_i32 = arith.constant 0 : i32
    %c0_i32_0 = arith.constant 0 : i32
    %c0_i32_1 = arith.constant 0 : i32
    return %c0_i32, %c0_i32_0 : i32, i32
  }
  func.func @transform_2(%arg0: i32) -> (i32, i32) {
    %c0_i32 = arith.constant 0 : i32
    %c0_i32_0 = arith.constant 0 : i32
    %c0_i32_1 = arith.constant 0 : i32
    return %c0_i32, %c0_i32_0 : i32, i32
  }
  func.func @transform_3(%arg0: i32) -> (i32, i32) {
    %c0_i32 = arith.constant 0 : i32
    %c0_i32_0 = arith.constant 0 : i32
    %c0_i32_1 = arith.constant 0 : i32
    return %c0_i32, %c0_i32_0 : i32, i32
  }
  func.func @transform_4(%arg0: i32) -> (i32, i32) {
    %c0_i32 = arith.constant 0 : i32
    %c0_i32_0 = arith.constant 0 : i32
    %c0_i32_1 = arith.constant 0 : i32
    return %c0_i32, %c0_i32_0 : i32, i32
  }
  func.func @transform_5(%arg0: i32) -> (i32, i32) {
    %c0_i32 = arith.constant 0 : i32
    %c0_i32_0 = arith.constant 0 : i32
    %c0_i32_1 = arith.constant 0 : i32
    return %c0_i32, %c0_i32_0 : i32, i32
  }
  func.func @transform_6(%arg0: i32) -> i32 {
    %c0_i32 = arith.constant 0 : i32
    %c0_i32_0 = arith.constant 0 : i32
    return %c0_i32 : i32
  }
  func.func @transform_7(%arg0: i32) -> (i32, i32) {
    %c0_i32 = arith.constant 0 : i32
    %c0_i32_0 = arith.constant 0 : i32
    return %arg0, %c0_i32 : i32, i32
  }
}

</mosaic_0001>

<bundles_post_ra>
// kernel: tpu_custom_call.1
= control target key start
LH: loop header
LB: loop body
LE: loop exit
PB: predicated region body
PF: predicated region fallthrough
CT: control target
= control target key end

     0   :  { %13 = vsyncpa [#allocation4], 0  ;;  %s377_s0 = inlined_call_operand.hbm [shape: f32[16,128], index: 0, kind: input, shape index: {}]   ;;  %s378_s1 = inlined_call_operand.hbm [shape: f32[128,128], index: 1, kind: input, shape index: {}]   ;;  %s379_s2 = inlined_call_operand.vmem [shape: f32[1,128], index: 2, kind: input, shape index: {}]   ;;  %s380_s3 = inlined_call_operand.hbm [shape: f32[128,128], index: 3, kind: input, shape index: {}]   ;;  %s381_s4 = inlined_call_operand.vmem [shape: f32[1,128], index: 4, kind: input, shape index: {}]   ;;  %s382_s5 = inlined_call_operand.vmem [shape: f32[1,128], index: 5, kind: input, shape index: {}]   ;;  %s383_s6 = inlined_call_operand.<no memory space> [shape: f32[1], index: 6, kind: input, shape index: {}]   ;;  %s384_s7 = inlined_call_operand.vmem [shape: f32[16,1], index: 7, kind: output, shape index: {}]  }
   0x1   :  { %14 = vsyncpa [#allocation6], 0  ;;  %s32_s26 = sshll.u32 %s378_s1, 4  ;;  %s305_s27 = smov [#allocation5]   ;;  %s33_s26 = int_to_ptr.hbm [resolvable:$true] %s32_s26 }
   0x2   :  { %s34_s28 = sshll.u32 %s305_s27, 4  ;;  %s19_s8 = sshll.u32 %s377_s0, 4  ;;  %s35_s28 = int_to_ptr.vmem [resolvable:$true] %s34_s28  ;;  %s20_s8 = int_to_ptr.hbm [resolvable:$true] %s19_s8 }
   0x3   :  { %s306_s9 = smov 128   ;;  %s307_s10 = smov 8  }
   0x4   :  { %40 = dma.hbm_to_vmem [thread:$0]  %s33_s26, 2048, %s35_s28, [#allocation6], %s306_s9, %s306_s9, %s307_s10  }
   0x5   :  { %s308_s11 = smov [#allocation3]   ;;  %s47_s15 = sshll.u32 %s380_s3, 4  ;;  %s48_s15 = int_to_ptr.hbm [resolvable:$true] %s47_s15 }
   0x6   :  { %s21_s12 = sshll.u32 %s308_s11, 4  ;;  %s309_s1 = smov [#allocation7]   ;;  %s22_s12 = int_to_ptr.vmem [resolvable:$true] %s21_s12 }
   0x7   :  { %27 = dma.hbm_to_vmem [thread:$0]  %s20_s8, 256, %s22_s12, [#allocation4], %s306_s9, %s306_s9, %s307_s10  }
   0x8   :  { %s49_s16 = sshll.u32 %s309_s1, 4  ;;  %s50_s16 = int_to_ptr.vmem [resolvable:$true] %s49_s16 }
   0x9   :  { %55 = dma.hbm_to_vmem [thread:$0]  %s48_s15, 2048, %s50_s16, [#allocation6], %s306_s9, %s306_s9, %s307_s10  }
   0xa   :  { %301 = dma.done.wait [#allocation4], 256  }
   0xb   :  { %302 = vsyncadd [#allocation4], 4294967040 }
   0xc   :  { %303 = dma.done.wait [#allocation6], 4096  }
   0xd   :  { %304 = vsyncadd [#allocation6], 4294963200  ;;  %v91_v0 = vld [vmem:[#allocation5 + $0x78] sm:$0xff]  ;;  %v90_v1 = vld [vmem:[#allocation5 + $0x70] sm:$0xff]  ;;  %v177_v51 = vstv %s383_s6  ;;  %vm180_vm0 = vcmask 7168  }
   0xe   :  { %189 = vmatpush.msra.mxu2 %v91_v0  ;;  %96 = vmatpush.msra.mxu0 %v91_v0  ;;  %v89_v2 = vld [vmem:[#allocation5 + $0x68] sm:$0xff]  ;;  %v88_v3 = vld [vmem:[#allocation5 + $0x60] sm:$0xff]  ;;  %v87_v4 = vld [vmem:[#allocation5 + $0x58] sm:$0xff] }
   0xf   :  { %v136_v5 = vld [vmem:[#allocation7 + $0x78] sm:$0xff]  ;;  %v135_v6 = vld [vmem:[#allocation7 + $0x70] sm:$0xff]  ;;  %v134_v8 = vld [vmem:[#allocation7 + $0x68] sm:$0xff] }
  0x10   :  { %190 = vmatpush.msra.mxu2 %v90_v1  ;;  %97 = vmatpush.msra.mxu0 %v90_v1  ;;  %v86_v7 = vld [vmem:[#allocation5 + $0x50] sm:$0xff]  ;;  %v85_v9 = vld [vmem:[#allocation5 + $0x48] sm:$0xff]  ;;  %v133_v10 = vld [vmem:[#allocation7 + $0x60] sm:$0xff] }
  0x11   :  { %141 = vmatpush.msra.mxu1 %v136_v5  ;;  %205 = vmatpush.msra.mxu3 %v136_v5  ;;  %v84_v11 = vld [vmem:[#allocation5 + $0x40] sm:$0xff]  ;;  %v132_v12 = vld [vmem:[#allocation7 + $0x58] sm:$0xff]  ;;  %v131_v14 = vld [vmem:[#allocation7 + $0x50] sm:$0xff] }
  0x12   :  { %191 = vmatpush.msra.mxu2 %v89_v2  ;;  %98 = vmatpush.msra.mxu0 %v89_v2  ;;  %v83_v13 = vld [vmem:[#allocation5 + $0x38] sm:$0xff]  ;;  %v82_v15 = vld [vmem:[#allocation5 + $0x30] sm:$0xff]  ;;  %v130_v16 = vld [vmem:[#allocation7 + $0x48] sm:$0xff] }
  0x13   :  { %142 = vmatpush.msra.mxu1 %v135_v6  ;;  %206 = vmatpush.msra.mxu3 %v135_v6  ;;  %v81_v17 = vld [vmem:[#allocation5 + $0x28] sm:$0xff]  ;;  %v129_v18 = vld [vmem:[#allocation7 + $0x40] sm:$0xff]  ;;  %v128_v20 = vld [vmem:[#allocation7 + $0x38] sm:$0xff] }
  0x14   :  { %192 = vmatpush.msra.mxu2 %v88_v3  ;;  %99 = vmatpush.msra.mxu0 %v88_v3  ;;  %v80_v19 = vld [vmem:[#allocation5 + $0x20] sm:$0xff]  ;;  %v79_v21 = vld [vmem:[#allocation5 + $0x18] sm:$0xff]  ;;  %v127_v22 = vld [vmem:[#allocation7 + $0x30] sm:$0xff] }
  0x15   :  { %143 = vmatpush.msra.mxu1 %v134_v8  ;;  %207 = vmatpush.msra.mxu3 %v134_v8  ;;  %v78_v23 = vld [vmem:[#allocation5 + $0x10] sm:$0xff]  ;;  %v126_v24 = vld [vmem:[#allocation7 + $0x28] sm:$0xff]  ;;  %v125_v26 = vld [vmem:[#allocation7 + $0x20] sm:$0xff] }
  0x16   :  { %193 = vmatpush.msra.mxu2 %v87_v4  ;;  %100 = vmatpush.msra.mxu0 %v87_v4  ;;  %v77_v25 = vld [vmem:[#allocation5 + $0x8] sm:$0xff]  ;;  %v76_v27 = vld [vmem:[#allocation5] sm:$0xff]  ;;  %v75_v28 = vld [vmem:[#allocation3 + $0x8] sm:$0xff] }
  0x17   :  { %144 = vmatpush.msra.mxu1 %v133_v10  ;;  %208 = vmatpush.msra.mxu3 %v133_v10  ;;  %v74_v29 = vld [vmem:[#allocation3] sm:$0xff]  ;;  %v124_v30 = vld [vmem:[#allocation7 + $0x18] sm:$0xff]  ;;  %v122_v32 = vld [vmem:[#allocation7 + $0x8] sm:$0xff] }
  0x18   :  { %194 = vmatpush.msra.mxu2 %v86_v7  ;;  %101 = vmatpush.msra.mxu0 %v86_v7  ;;  %v123_v31 = vld [vmem:[#allocation7 + $0x10] sm:$0xff]  ;;  %v121_v33 = vld [vmem:[#allocation7] sm:$0xff] }
  0x19   :  { %145 = vmatpush.msra.mxu1 %v132_v12  ;;  %209 = vmatpush.msra.mxu3 %v132_v12  ;;  %v226_v34 = vld [vmem:[%s379_s2] ss:$0 sm:$0xff] }
  0x1a   :  { %195 = vmatpush.msra.mxu2 %v85_v9  ;;  %102 = vmatpush.msra.mxu0 %v85_v9  ;;  %v227_v41 = vld [vmem:[%s381_s4] ss:$0 sm:$0xff] }
  0x1b   :  { %146 = vmatpush.msra.mxu1 %v131_v14  ;;  %210 = vmatpush.msra.mxu3 %v131_v14  ;;  %v228_v44 = vld [vmem:[%s382_s5] ss:$0 sm:$0xff] }
  0x1c   :  { %196 = vmatpush.msra.mxu2 %v84_v11  ;;  %103 = vmatpush.msra.mxu0 %v84_v11 }
  0x1d   :  { %147 = vmatpush.msra.mxu1 %v130_v16  ;;  %211 = vmatpush.msra.mxu3 %v130_v16 }
  0x1e   :  { %197 = vmatpush.msra.mxu2 %v83_v13  ;;  %104 = vmatpush.msra.mxu0 %v83_v13 }
  0x1f   :  { %148 = vmatpush.msra.mxu1 %v129_v18  ;;  %212 = vmatpush.msra.mxu3 %v129_v18 }
  0x20   :  { %198 = vmatpush.msra.mxu2 %v82_v15  ;;  %105 = vmatpush.msra.mxu0 %v82_v15 }
  0x21   :  { %149 = vmatpush.msra.mxu1 %v128_v20  ;;  %213 = vmatpush.msra.mxu3 %v128_v20 }
  0x22   :  { %199 = vmatpush.msra.mxu2 %v81_v17  ;;  %106 = vmatpush.msra.mxu0 %v81_v17 }
  0x23   :  { %150 = vmatpush.msra.mxu1 %v127_v22  ;;  %214 = vmatpush.msra.mxu3 %v127_v22 }
  0x24   :  { %200 = vmatpush.msra.mxu2 %v80_v19  ;;  %107 = vmatpush.msra.mxu0 %v80_v19 }
  0x25   :  { %151 = vmatpush.msra.mxu1 %v126_v24  ;;  %215 = vmatpush.msra.mxu3 %v126_v24 }
  0x26   :  { %201 = vmatpush.msra.mxu2 %v79_v21  ;;  %108 = vmatpush.msra.mxu0 %v79_v21 }
  0x27   :  { %152 = vmatpush.msra.mxu1 %v125_v26  ;;  %216 = vmatpush.msra.mxu3 %v125_v26 }
  0x28   :  { %202 = vmatpush.msra.mxu2 %v78_v23  ;;  %109 = vmatpush.msra.mxu0 %v78_v23 }
  0x29   :  { %153 = vmatpush.msra.mxu1 %v124_v30  ;;  %217 = vmatpush.msra.mxu3 %v124_v30 }
  0x2a   :  { %203 = vmatpush.msra.mxu2 %v77_v25  ;;  %110 = vmatpush.msra.mxu0 %v77_v25 }
  0x2b   :  { %154 = vmatpush.msra.mxu1 %v123_v31  ;;  %218 = vmatpush.msra.mxu3 %v123_v31 }
  0x2c   :  { %204 = vmatpush.msra.mxu2 %v76_v27  ;;  %111 = vmatpush.msra.mxu0 %v76_v27 }
  0x2d   :  { %115 = vmatmul.f32.vlgmr.msra.gmra.mxu2 %v75_v28  ;;  %112 = vmatmul.f32.vlgmr.msra.gmra.mxu0 %v74_v29 }
  0x2e   :  { %155 = vmatpush.msra.mxu1 %v122_v32  ;;  %219 = vmatpush.msra.mxu3 %v122_v32 }
  0x30   :  { %156 = vmatpush.msra.mxu1 %v121_v33  ;;  %220 = vmatpush.msra.mxu3 %v121_v33 }
  0xaa   :  { %v113_v35 = vpop.f32.mrf.mxu0 }
  0xab   :  { %v114_v36 = vadd.f32 %v226_v34, %v113_v35 }
  0xad   :  { %v119_v37 = vmax.f32 %v114_v36, 0.0 }
  0xaf   :  { %157 = vmatmul.f32.vlgmr.msra.gmra.mxu1 %v119_v37 }
  0xb0   :  { %v116_v38 = vpop.f32.mrf.mxu2 }
  0xb1   :  { %v117_v39 = vadd.f32 %v226_v34, %v116_v38 }
  0xb3   :  { %v120_v40 = vmax.f32 %v117_v39, 0.0 }
  0xb5   :  { %160 = vmatmul.f32.vlgmr.msra.gmra.mxu3 %v120_v40 }
 0x12c   :  { %v158_v42 = vpop.f32.mrf.mxu1 }
 0x12d   :  { %v159_v43 = vadd.f32 %v227_v41, %v158_v42 }
 0x12f   :  { %v164_v45 = vmax.f32 %v159_v43, 0.0 }
 0x131   :  { %v170_v46 = vmul.f32 %v228_v44, %v164_v45 }
 0x133   :  { %172 = vadd.xlane.f32.xlu0 %v170_v46 }
 0x138   :  { %v161_v47 = vpop.f32.mrf.mxu3 }
 0x139   :  { %v162_v48 = vadd.f32 %v227_v41, %v161_v47 }
 0x13b   :  { %v165_v49 = vmax.f32 %v162_v48, 0.0 }
 0x13d   :  { %v171_v50 = vmul.f32 %v228_v44, %v165_v49 }
 0x13f   :  { %174 = vadd.xlane.f32.xlu0 %v171_v50 }
 0x1a6   :  { %v173_v52 = vpop.xlane.xlu0 %172 }
 0x1a7   :  { %v178_v53 = vadd.f32 %v177_v51, %v173_v52 }
 0x1a9   :  { %181 = vst.msk [vmem:[%s384_s7] sm:$0xff] %vm180_vm0, %v178_v53 }
 0x1b2   :  { %v175_v54 = vpop.xlane.xlu0 %174 }
 0x1b3   :  { %v179_v55 = vadd.f32 %v177_v51, %v175_v54 }
 0x1b5   :  { %182 = vst.msk [vmem:[%s384_s7 + $0x8] sm:$0xff] %vm180_vm0, %v179_v55 }
 0x1b6   :  { %187 = vsyncpa [#allocation4], 1 }
 0x1b7   :  { %188 = vsyncpa [#allocation6], 1 }

</bundles_post_ra>
